<compile_context>
chip_gen: v7x
topology: tpu7x:2x2x1
jax: 0.10.0
libtpu: 0.0.40
codegen_flags: <defaults>
</compile_context>

<pallas_src>
import functools
import math

import jax
import jax.numpy as jnp
from jax import lax
from jax.experimental import pallas as pl
from jax.experimental.pallas import tpu as pltpu

EPS = 1e-5                             # nn.LayerNorm default eps
VMEM_LIMIT_BYTES = 48 * 1024 * 1024    # fits v7x (64 MiB phys) and v5e/v6e


# ---------------------------------------------------------------------------
# Exact (erf-based) GELU, matching torch.nn.GELU() default.  erf is evaluated
# with Abramowitz & Stegun 7.1.26 (|err| < 1.5e-7): only elementwise ops
# (mul/add/div/exp/select) that lower cleanly in Mosaic.
# ---------------------------------------------------------------------------
def _erf_approx(z):
    a1, a2, a3, a4, a5 = (0.254829592, -0.284496736, 1.421413741,
                          -1.453152027, 1.061405429)
    p = 0.3275911
    az = jnp.abs(z)
    t = 1.0 / (1.0 + p * az)
    poly = ((((a5 * t + a4) * t + a3) * t + a2) * t + a1) * t
    e = 1.0 - poly * jnp.exp(-az * az)
    return jnp.where(z >= 0, e, -e)


def _gelu_exact(x):
    return 0.5 * x * (1.0 + _erf_approx(x * 0.7071067811865476))


# ---------------------------------------------------------------------------
# Path A: fused LayerNorm -> GEMM -> [+bias] -> [GELU] -> [+residual].
# Grid (row tiles, col tiles), col tiles innermost ("arbitrary" because the LN
# scratch carries state across them).  LN is computed once per row tile into a
# bf16 VMEM scratch reused for all column tiles.
# ---------------------------------------------------------------------------
def _fused_ln_linear_kernel(*refs, has_bias, do_gelu, has_residual):
    it = iter(refs)
    x_ref, g_ref, b_ref, w_ref = next(it), next(it), next(it), next(it)
    bias_ref = next(it) if has_bias else None
    res_ref = next(it) if has_residual else None
    o_ref = next(it)
    xln_ref = next(it)                         # (tr, K) bf16 scratch

    @pl.when(pl.program_id(1) == 0)
    def _():
        x = x_ref[...].astype(jnp.float32)
        mean = jnp.mean(x, axis=-1, keepdims=True)
        xc = x - mean
        var = jnp.mean(xc * xc, axis=-1, keepdims=True)   # two-pass variance
        xn = (xc * lax.rsqrt(var + EPS) * g_ref[...].astype(jnp.float32)
              + b_ref[...].astype(jnp.float32))
        xln_ref[...] = xn.astype(xln_ref.dtype)

    # bf16 x bf16 -> f32 accumulation on the MXU.
    acc = jnp.dot(xln_ref[...], w_ref[...], preferred_element_type=jnp.float32)
    if has_bias:
        acc = acc + bias_ref[...].astype(jnp.float32)
    if do_gelu:
        acc = _gelu_exact(acc)
    if has_residual:
        acc = acc + res_ref[...].astype(jnp.float32)
    o_ref[...] = acc.astype(o_ref.dtype)


# ---------------------------------------------------------------------------
# Path B: K-tiled GEMM (no LN) -> [+bias] -> [GELU] -> [+residual].
# Grid (row tiles, col tiles, K tiles), K innermost, f32 VMEM accumulator.
# ---------------------------------------------------------------------------
def _fused_linear_ktiled_kernel(*refs, has_bias, do_gelu, has_residual):
    it = iter(refs)
    x_ref, w_ref = next(it), next(it)
    bias_ref = next(it) if has_bias else None
    res_ref = next(it) if has_residual else None
    o_ref = next(it)
    acc_ref = next(it)                         # (tr, tn) f32 scratch

    @pl.when(pl.program_id(2) == 0)
    def _():
        acc_ref[...] = jnp.zeros_like(acc_ref)

    acc_ref[...] += jnp.dot(x_ref[...].astype(jnp.bfloat16),
                            w_ref[...].astype(jnp.bfloat16),
                            preferred_element_type=jnp.float32)

    @pl.when(pl.program_id(2) == pl.num_programs(2) - 1)
    def _():
        acc = acc_ref[...]
        if has_bias:
            acc = acc + bias_ref[...].astype(jnp.float32)
        if do_gelu:
            acc = _gelu_exact(acc)
        if has_residual:
            acc = acc + res_ref[...].astype(jnp.float32)
        o_ref[...] = acc.astype(o_ref.dtype)


def fused_linear(x, w, *, ln=None, bias=None, gelu=False, residual=None,
                 out_dtype=None, tile_r=512, tile_n=256, tile_k=512):
    """y = [LN(x)] @ w [+ bias] [-> GELU] [+ residual];  x: (R, K), w: (K, N)."""
    R, K = x.shape
    Kw, N = w.shape
    assert K == Kw
    if out_dtype is None:
        out_dtype = residual.dtype if residual is not None else x.dtype
    w = w.astype(jnp.bfloat16)                       # bf16 weight streaming

    tr = R if R <= tile_r else tile_r                # multiple of 8 (or full)
    tn = N if N <= tile_n else tile_n                # multiple of 128 (or full)
    gr, gn = pl.cdiv(R, tr), pl.cdiv(N, tn)

    isz = lambda a: jnp.dtype(a.dtype).itemsize
    bytes_accessed = (R * K * isz(x) + K * N * 2
                      + R * N * jnp.dtype(out_dtype).itemsize)
    if residual is not None:
        bytes_accessed += R * N * isz(residual)
    cost = pl.CostEstimate(flops=2 * R * K * N,
                           transcendentals=(R * N if gelu else 0),
                           bytes_accessed=bytes_accessed)

    if ln is not None:
        # ---------------- full-K path with fused LayerNorm -----------------
        g, b = ln
        in_specs = [pl.BlockSpec((tr, K), lambda i, j: (i, 0)),
                    pl.BlockSpec((1, K), lambda i, j: (0, 0)),
                    pl.BlockSpec((1, K), lambda i, j: (0, 0)),
                    pl.BlockSpec((K, tn), lambda i, j: (0, j))]
        args = [x, g.reshape(1, K).astype(jnp.float32),
                b.reshape(1, K).astype(jnp.float32), w]
        if bias is not None:
            in_specs.append(pl.BlockSpec((1, tn), lambda i, j: (0, j)))
            args.append(bias.reshape(1, N).astype(jnp.float32))
        if residual is not None:
            in_specs.append(pl.BlockSpec((tr, tn), lambda i, j: (i, j)))
            args.append(residual)
        kernel = functools.partial(_fused_ln_linear_kernel,
                                   has_bias=bias is not None, do_gelu=gelu,
                                   has_residual=residual is not None)
        return pl.pallas_call(
            kernel,
            out_shape=jax.ShapeDtypeStruct((R, N), out_dtype),
            grid_spec=pltpu.PrefetchScalarGridSpec(
                num_scalar_prefetch=0,
                grid=(gr, gn),
                in_specs=in_specs,
                out_specs=pl.BlockSpec((tr, tn), lambda i, j: (i, j)),
                scratch_shapes=[pltpu.VMEM((tr, K), jnp.bfloat16)]),
            compiler_params=pltpu.CompilerParams(
                dimension_semantics=("parallel", "arbitrary"),
                vmem_limit_bytes=VMEM_LIMIT_BYTES),
            cost_estimate=cost,
        )(*args)

    # ------------------- K-tiled accumulation path (no LN) ------------------
    tk = tile_k if (K % tile_k == 0) else K          # exact tiling or full K
    gk = K // tk
    in_specs = [pl.BlockSpec((tr, tk), lambda i, j, k: (i, k)),
                pl.BlockSpec((tk, tn), lambda i, j, k: (k, j))]
    args = [x, w]
    if bias is not None:
        in_specs.append(pl.BlockSpec((1, tn), lambda i, j, k: (0, j)))
        args.append(bias.reshape(1, N).astype(jnp.float32))
    if residual is not None:
        in_specs.append(pl.BlockSpec((tr, tn), lambda i, j, k: (i, j)))
        args.append(residual)
    kernel = functools.partial(_fused_linear_ktiled_kernel,
                               has_bias=bias is not None, do_gelu=gelu,
                               has_residual=residual is not None)
    return pl.pallas_call(
        kernel,
        out_shape=jax.ShapeDtypeStruct((R, N), out_dtype),
        grid_spec=pltpu.PrefetchScalarGridSpec(
            num_scalar_prefetch=0,
            grid=(gr, gn, gk),
            in_specs=in_specs,
            out_specs=pl.BlockSpec((tr, tn), lambda i, j, k: (i, j)),
            scratch_shapes=[pltpu.VMEM((tr, tn), jnp.float32)]),
        compiler_params=pltpu.CompilerParams(
            dimension_semantics=("parallel", "parallel", "arbitrary"),
            vmem_limit_bytes=VMEM_LIMIT_BYTES),
        cost_estimate=cost,
    )(*args)


# ---------------------------------------------------------------------------
# Self-attention: one batch element per grid step, all heads handled inside
# the kernel (static head loop), reading the flat bf16 (B, S, 3*H*Dh) qkv slab
# directly (no transposes) and writing a lane-dense (B, S, H*Dh) output slab.
# Softmax is f32 with max subtraction and EUP reciprocal; both dots take bf16
# operands with f32 accumulation.
# ---------------------------------------------------------------------------
def _attention_kernel(qkv_ref, o_ref, *, num_heads, dim_head, scale):
    hd = num_heads * dim_head
    qkv = qkv_ref[0]                                   # (S, 3*H*Dh), bf16
    outs = []
    for h in range(num_heads):
        q = qkv[:, h * dim_head:(h + 1) * dim_head]
        k = qkv[:, hd + h * dim_head:hd + (h + 1) * dim_head]
        v = qkv[:, 2 * hd + h * dim_head:2 * hd + (h + 1) * dim_head]
        # q @ k^T (contract over the head dim, no explicit transpose).
        s = lax.dot_general(q, k, (((1,), (1,)), ((), ())),
                            preferred_element_type=jnp.float32) * scale
        m = jnp.max(s, axis=-1, keepdims=True)
        p = jnp.exp(s - m)
        l = jnp.sum(p, axis=-1, keepdims=True)
        attn = p * pl.reciprocal(l)                    # EUP recip + VPU mul
        out = jnp.dot(attn.astype(v.dtype), v,
                      preferred_element_type=jnp.float32)
        outs.append(out.astype(o_ref.dtype))
    # Single lane-dense store of the whole (S, H*Dh) slab.
    o_ref[0] = outs[0] if num_heads == 1 else jnp.concatenate(outs, axis=-1)


def attention_pallas(qkv, num_heads, dim_head, scale):
    """qkv: (B, S, 3*H*Dh) -> (B, S, H*Dh); head layout matches chunk(3),(h d)."""
    B, S, three_hd = qkv.shape
    hd = num_heads * dim_head
    assert three_hd == 3 * hd
    kernel = functools.partial(_attention_kernel, num_heads=num_heads,
                               dim_head=dim_head, scale=scale)
    return pl.pallas_call(
        kernel,
        out_shape=jax.ShapeDtypeStruct((B, S, hd), qkv.dtype),
        grid_spec=pltpu.PrefetchScalarGridSpec(
            num_scalar_prefetch=0,
            grid=(B,),
            in_specs=[pl.BlockSpec((1, S, three_hd), lambda b: (b, 0, 0))],
            out_specs=pl.BlockSpec((1, S, hd), lambda b: (b, 0, 0))),
        compiler_params=pltpu.CompilerParams(
            dimension_semantics=("parallel",),
            vmem_limit_bytes=VMEM_LIMIT_BYTES),
    )(qkv)


# ---------------------------------------------------------------------------
# Full TransformerEncoder forward (eval mode).
# ---------------------------------------------------------------------------
def transformer_encoder_pallas(x, params):
    B, S, D = x.shape
    R = B * S
    x2 = x.reshape(R, D)                               # residual stream (f32)
    for lyr in params["layers"]:
        H, Dh = lyr["num_heads"], lyr["dim_head"]
        HD = H * Dh
        scale = float(Dh) ** -0.5
        w_qkv = lyr["w_qkv"].astype(jnp.bfloat16)
        w_o = lyr["w_o"].astype(jnp.bfloat16)
        w_ff1 = lyr["w_ff1"].astype(jnp.bfloat16)
        w_ff2 = lyr["w_ff2"].astype(jnp.bfloat16)

        # --- attention block: LN fused into QKV projection (no bias) --------
        qkv = fused_linear(x2, w_qkv, ln=(lyr["ln1_g"], lyr["ln1_b"]),
                           out_dtype=jnp.bfloat16)     # (R, 3*HD) bf16
        qkv = qkv.reshape(B, S, 3 * HD)                # free reshape, no transpose
        # TODO(synk): the module stashes att.att_weights on self.attention_output
        # (a Python side effect); the probabilities are not exported here.
        attn = attention_pallas(qkv, H, Dh, scale)     # (B, S, HD) bf16
        attn = attn.reshape(R, HD)
        # output projection + residual add (Dropout/DropPath = identity, eval)
        x2 = fused_linear(attn, w_o, bias=lyr["b_o"], residual=x2)

        # --- FFN block: LN + GEMM + bias + GELU fused; then GEMM + residual -
        h = fused_linear(x2, w_ff1, ln=(lyr["ln2_g"], lyr["ln2_b"]),
                         bias=lyr["b_ff1"], gelu=True, out_dtype=jnp.bfloat16)
        x2 = fused_linear(h, w_ff2, bias=lyr["b_ff2"], residual=x2)
    return x2.reshape(B, S, D)


# ---------------------------------------------------------------------------
# Pure-JAX references.  matmul_dtype=float32 reproduces the PyTorch module
# exactly; matmul_dtype=bfloat16 mirrors the kernel's mixed-precision strategy
# (bf16 matmul operands / intermediates, f32 accumulation & softmax/LN).
# ---------------------------------------------------------------------------
def reference_encoder(x, params, matmul_dtype=jnp.float32):
    f32 = jnp.float32

    def ln(t, g, b):
        tf = t.astype(f32)
        mean = jnp.mean(tf, axis=-1, keepdims=True)
        var = jnp.mean((tf - mean) ** 2, axis=-1, keepdims=True)
        return (tf - mean) * lax.rsqrt(var + EPS) * g + b

    def mm(a, b):
        return jnp.dot(a.astype(matmul_dtype), b.astype(matmul_dtype),
                       preferred_element_type=f32)

    emulate = matmul_dtype != jnp.float32
    gelu_fn = _gelu_exact if emulate else (
        lambda t: jax.nn.gelu(t, approximate=False))

    B, S, D = x.shape
    for lyr in params["layers"]:
        H, Dh = lyr["num_heads"], lyr["dim_head"]
        hn = ln(x, lyr["ln1_g"], lyr["ln1_b"])
        qkv = mm(hn, lyr["w_qkv"]).astype(matmul_dtype)
        qkv = qkv.reshape(B, S, 3, H, Dh)
        q = qkv[:, :, 0].transpose(0, 2, 1, 3)
        k = qkv[:, :, 1].transpose(0, 2, 1, 3)
        v = qkv[:, :, 2].transpose(0, 2, 1, 3)
        s = jnp.einsum("bhnd,bhmd->bhnm", q, k,
                       preferred_element_type=f32).astype(f32) * (float(Dh) ** -0.5)
        a = jax.nn.softmax(s, axis=-1)
        o = jnp.einsum("bhnm,bhmd->bhnd", a.astype(matmul_dtype), v,
                       preferred_element_type=f32)
        o = o.transpose(0, 2, 1, 3).reshape(B, S, H * Dh).astype(matmul_dtype)
        x = x + (mm(o, lyr["w_o"]) + lyr["b_o"])
        hn = ln(x, lyr["ln2_g"], lyr["ln2_b"])
        hh = gelu_fn(mm(hn, lyr["w_ff1"]) + lyr["b_ff1"]).astype(matmul_dtype)
        x = x + (mm(hh, lyr["w_ff2"]) + lyr["b_ff2"])
    return x


def init_params(key, D, num_layers, num_heads, dim_head, mlp_dim):
    layers = []
    hd = num_heads * dim_head
    for _ in range(num_layers):
        key, *ks = jax.random.split(key, 12)
        layers.append(dict(
            num_heads=num_heads, dim_head=dim_head,
            ln1_g=1.0 + 0.1 * jax.random.normal(ks[0], (D,), jnp.float32),
            ln1_b=0.1 * jax.random.normal(ks[1], (D,), jnp.float32),
            w_qkv=jax.random.normal(ks[2], (D, 3 * hd), jnp.float32) / math.sqrt(D),
            w_o=jax.random.normal(ks[3], (hd, D), jnp.float32) / math.sqrt(hd),
            b_o=0.02 * jax.random.normal(ks[4], (D,), jnp.float32),
            ln2_g=1.0 + 0.1 * jax.random.normal(ks[5], (D,), jnp.float32),
            ln2_b=0.1 * jax.random.normal(ks[6], (D,), jnp.float32),
            w_ff1=jax.random.normal(ks[7], (D, mlp_dim), jnp.float32) / math.sqrt(D),
            b_ff1=0.02 * jax.random.normal(ks[8], (mlp_dim,), jnp.float32),
            w_ff2=jax.random.normal(ks[9], (mlp_dim, D), jnp.float32) / math.sqrt(mlp_dim),
            b_ff2=0.02 * jax.random.normal(ks[10], (D,), jnp.float32),
        ))
    return {"layers": layers}


if __name__ == "__main__":
    # Small deterministic example: batch=2, seq=8, hidden=32, 2 layers,
    # 2 heads x head_dim 16, mlp_dim 64 (dropout=0 -> eval-mode forward).
    B, S, D = 2, 8, 32
    num_layers, num_heads, dim_head, mlp_dim = 2, 2, 16, 64

    key = jax.random.PRNGKey(0)
    key, xk = jax.random.split(key)
    x = jax.random.normal(xk, (B, S, D), dtype=jnp.float32)
    params = init_params(key, D, num_layers, num_heads, dim_head, mlp_dim)

    out = transformer_encoder_pallas(x, params)
    out = jax.block_until_ready(out)

    assert out.shape == x.shape and out.dtype == x.dtype
    assert bool(jnp.all(jnp.isfinite(out)))

    # Tight check vs. a reference that mirrors the kernel's bf16 mixed precision.
    ref_emul = reference_encoder(x, params, matmul_dtype=jnp.bfloat16)
    err_emul = float(jnp.max(jnp.abs(out - ref_emul)))
    assert jnp.allclose(out, ref_emul, atol=1e-2, rtol=1e-2), err_emul

    # Loose structural sanity check vs. the exact f32 module semantics
    # (difference is bf16 matmul rounding only).
    ref_f32 = reference_encoder(x, params, matmul_dtype=jnp.float32)
    err_f32 = float(jnp.max(jnp.abs(out - ref_f32)))
    assert jnp.allclose(out, ref_f32, atol=0.3, rtol=0.3), err_f32

    print("KERNEL_OK")
</pallas_src>

<mosaic_0001>
module attributes {stable_mosaic.version = 11 : i64} {
  func.func @_fused_ln_linear_kernel(%arg0: i32, %arg1: i32, %arg2: memref<16x32xf32, #tpu.memory_space<vmem>>, %arg3: memref<1x32xf32, #tpu.memory_space<vmem>>, %arg4: memref<1x32xf32, #tpu.memory_space<vmem>>, %arg5: memref<32x96xbf16, #tpu.memory_space<vmem>>, %arg6: memref<16x96xbf16, #tpu.memory_space<vmem>>, %arg7: memref<16x32xbf16, #tpu.memory_space<vmem>>) attributes {dimension_semantics = [#tpu.dimension_semantics<parallel>, #tpu.dimension_semantics<arbitrary>], iteration_bounds = array<i64: 1, 1>, scalar_prefetch = 0 : i64, scratch_operands = 1 : i64, tpu.core_type = #tpu.core_type<tc>, window_params = [{transform_indices = @transform_0, window_bounds = array<i64: 16, 32>}, {pipeline_mode = #tpu.pipeline_mode<synchronous>, transform_indices = @transform_1, window_bounds = array<i64: 1, 32>}, {pipeline_mode = #tpu.pipeline_mode<synchronous>, transform_indices = @transform_2, window_bounds = array<i64: 1, 32>}, {transform_indices = @transform_3, window_bounds = array<i64: 32, 96>}, {transform_indices = @transform_4, window_bounds = array<i64: 16, 96>}]} {
    %c0_i32 = arith.constant 0 : i32
    %0 = arith.cmpi eq, %arg1, %c0_i32 : i32
    %1 = arith.extui %0 : i1 to i32
    %c0_i32_0 = arith.constant 0 : i32
    %2 = arith.cmpi ne, %1, %c0_i32_0 : i32
    scf.if %2 {
      %c0_6 = arith.constant 0 : index
      %c0_7 = arith.constant 0 : index
      %8 = vector.load %arg2[%c0_6, %c0_7] : memref<16x32xf32, #tpu.memory_space<vmem>>, vector<16x32xf32>
      %cst_8 = arith.constant dense<0.000000e+00> : vector<16xf32>
      %9 = vector.multi_reduction <add>, %8, %cst_8 [1] : vector<16x32xf32> to vector<16xf32>
      %10 = vector.shape_cast %9 : vector<16xf32> to vector<16x1xf32>
      %cst_9 = arith.constant 3.200000e+01 : f32
      %11 = vector.broadcast %cst_9 : f32 to vector<16x1xf32>
      %12 = arith.divf %10, %11 : vector<16x1xf32>
      %13 = vector.broadcast %12 : vector<16x1xf32> to vector<16x32xf32>
      %14 = arith.subf %8, %13 : vector<16x32xf32>
      %15 = arith.mulf %14, %14 : vector<16x32xf32>
      %cst_10 = arith.constant dense<0.000000e+00> : vector<16xf32>
      %16 = vector.multi_reduction <add>, %15, %cst_10 [1] : vector<16x32xf32> to vector<16xf32>
      %17 = vector.shape_cast %16 : vector<16xf32> to vector<16x1xf32>
      %cst_11 = arith.constant 3.200000e+01 : f32
      %18 = vector.broadcast %cst_11 : f32 to vector<16x1xf32>
      %19 = arith.divf %17, %18 : vector<16x1xf32>
      %cst_12 = arith.constant 9.99999974E-6 : f32
      %20 = vector.broadcast %cst_12 : f32 to vector<16x1xf32>
      %21 = arith.addf %19, %20 : vector<16x1xf32>
      %22 = math.rsqrt %21 : vector<16x1xf32>
      %23 = vector.broadcast %22 : vector<16x1xf32> to vector<16x32xf32>
      %24 = arith.mulf %14, %23 : vector<16x32xf32>
      %c0_13 = arith.constant 0 : index
      %c0_14 = arith.constant 0 : index
      %25 = vector.load %arg3[%c0_13, %c0_14] : memref<1x32xf32, #tpu.memory_space<vmem>>, vector<1x32xf32>
      %26 = vector.broadcast %25 : vector<1x32xf32> to vector<16x32xf32>
      %27 = arith.mulf %24, %26 : vector<16x32xf32>
      %c0_15 = arith.constant 0 : index
      %c0_16 = arith.constant 0 : index
      %28 = vector.load %arg4[%c0_15, %c0_16] : memref<1x32xf32, #tpu.memory_space<vmem>>, vector<1x32xf32>
      %29 = vector.broadcast %28 : vector<1x32xf32> to vector<16x32xf32>
      %30 = arith.addf %27, %29 : vector<16x32xf32>
      %31 = arith.truncf %30 : vector<16x32xf32> to vector<16x32xbf16>
      %c0_17 = arith.constant 0 : index
      %c0_18 = arith.constant 0 : index
      %32 = vector.load %arg7[%c0_17, %c0_18] : memref<16x32xbf16, #tpu.memory_space<vmem>>, vector<16x32xbf16>
      tpu.vector_store %arg7[%c0_17, %c0_18], %31 {strides = array<i32>} : memref<16x32xbf16, #tpu.memory_space<vmem>>, vector<16x32xbf16>,
    } else {
    }
    %c0 = arith.constant 0 : index
    %c0_1 = arith.constant 0 : index
    %3 = vector.load %arg7[%c0, %c0_1] : memref<16x32xbf16, #tpu.memory_space<vmem>>, vector<16x32xbf16>
    %c0_2 = arith.constant 0 : index
    %c0_3 = arith.constant 0 : index
    %4 = vector.load %arg5[%c0_2, %c0_3] : memref<32x96xbf16, #tpu.memory_space<vmem>>, vector<32x96xbf16>
    %cst = arith.constant dense<0.000000e+00> : vector<16x96xf32>
    %5 = tpu.matmul %3, %4, %cst {dimension_numbers = #tpu.dot_dimension_numbers<[1], [0], [0], [1], [0, 0, 1, 1], [], []>} : vector<16x32xbf16>, vector<32x96xbf16>, vector<16x96xf32> -> vector<16x96xf32>
    %6 = arith.truncf %5 : vector<16x96xf32> to vector<16x96xbf16>
    %c0_4 = arith.constant 0 : index
    %c0_5 = arith.constant 0 : index
    %7 = vector.load %arg6[%c0_4, %c0_5] : memref<16x96xbf16, #tpu.memory_space<vmem>>, vector<16x96xbf16>
    tpu.vector_store %arg6[%c0_4, %c0_5], %6 {strides = array<i32>} : memref<16x96xbf16, #tpu.memory_space<vmem>>, vector<16x96xbf16>,
    return
  }
  func.func @transform_0(%arg0: i32, %arg1: i32) -> (i32, i32) {
    %c0_i32 = arith.constant 0 : i32
    %c0_i32_0 = arith.constant 0 : i32
    return %arg0, %c0_i32 : i32, i32
  }
  func.func @transform_1(%arg0: i32, %arg1: i32) -> (i32, i32) {
    %c0_i32 = arith.constant 0 : i32
    %c0_i32_0 = arith.constant 0 : i32
    %c0_i32_1 = arith.constant 0 : i32
    return %c0_i32, %c0_i32_0 : i32, i32
  }
  func.func @transform_2(%arg0: i32, %arg1: i32) -> (i32, i32) {
    %c0_i32 = arith.constant 0 : i32
    %c0_i32_0 = arith.constant 0 : i32
    %c0_i32_1 = arith.constant 0 : i32
    return %c0_i32, %c0_i32_0 : i32, i32
  }
  func.func @transform_3(%arg0: i32, %arg1: i32) -> (i32, i32) {
    %c0_i32 = arith.constant 0 : i32
    %c0_i32_0 = arith.constant 0 : i32
    return %c0_i32, %arg1 : i32, i32
  }
  func.func @transform_4(%arg0: i32, %arg1: i32) -> (i32, i32) {
    %c0_i32 = arith.constant 0 : i32
    return %arg0, %arg1 : i32, i32
  }
}

</mosaic_0001>

<bundles_post_ra>
// kernel: tpu_custom_call.1
= control target key start
LH: loop header
LB: loop body
LE: loop exit
PB: predicated region body
PF: predicated region fallthrough
CT: control target
= control target key end

     0   :  { %9 = vsyncpa [#allocation4], 0  ;;  %s387_s0 = inlined_call_operand.hbm [shape: f32[16,32], index: 0, kind: input, shape index: {}]   ;;  %s388_s1 = inlined_call_operand.vmem [shape: f32[1,32], index: 1, kind: input, shape index: {}]   ;;  %s389_s2 = inlined_call_operand.vmem [shape: f32[1,32], index: 2, kind: input, shape index: {}]   ;;  %s390_s3 = inlined_call_operand.hbm [shape: bf16[32,96], index: 3, kind: input, shape index: {}]   ;;  %s391_s4 = inlined_call_operand.hbm [shape: bf16[16,96], index: 4, kind: output, shape index: {}]  }
   0x1   :  { %10 = vsyncpa [#allocation7], 0 }
   0x2   :  { %11 = vsyncpa [#allocation5], 0  ;;  %s299_s15 = smov [#allocation3]   ;;  %s227_s19 = scalar_lea.hbm %s387_s0, 256 }
   0x3   :  { %s17_s16 = sshll.u32 %s299_s15, 4  ;;  %p228_p0 = scmp.ne.s32.totalorder %s387_s0, %s227_s19  ;;  %s18_s16 = int_to_ptr.vmem [resolvable:$true] %s17_s16 }
   0x4   :  { %p231_p1 = scmp.lt.u32.totalorder %s227_s19, %s387_s0 }
   0x6   :  { %p233_p2 = pnand %p231_p1, %p228_p0 }
   0x8   :  { %236 = shalt.err (!%p233_p2)
}
   0x9   :  { %s237_s24 = scalar_lea.vmem %s18_s16, 256  ;;  %p242_p4 = scmp.lt.s32.totalorder %s18_s16, %s18_s16 }
   0xa   :  { %p238_p3 = scmp.ne.s32.totalorder %s18_s16, %s237_s24  ;;  %p243_p5 = scmp.lt.s32.totalorder %s237_s24, %s237_s24 }
   0xc   :  { %p244_p6 = por %p243_p5, %p242_p4 }
   0xe   :  { %p245_p7 = pnand %p244_p6, %p238_p3 }
  0x10   :  { %248 = shalt.err (!%p245_p7)
}
  0x11   :  { %s300_s25 = smov 128   ;;  %s301_s26 = smov 8  }
  0x12   :  { %23 = dma.hbm_to_vmem [thread:$0]  %s387_s0, 256, %s18_s16, [#allocation4], %s300_s25, %s300_s25, %s301_s26  }
  0x13   :  { %s302_s29 = smov [#allocation6]   ;;  %s249_s7 = scalar_lea.hbm %s390_s3, 256 }
  0x14   :  { %s33_s30 = sshll.u32 %s302_s29, 4  ;;  %p250_p8 = scmp.ne.s32.totalorder %s390_s3, %s249_s7  ;;  %s34_s30 = int_to_ptr.vmem [resolvable:$true] %s33_s30 }
  0x15   :  { %p253_p9 = scmp.lt.u32.totalorder %s249_s7, %s390_s3 }
  0x17   :  { %p255_p10 = pnand %p253_p9, %p250_p8 }
  0x19   :  { %258 = shalt.err (!%p255_p10)
}
  0x1a   :  { %s259_s12 = scalar_lea.vmem %s34_s30, 256  ;;  %p264_p12 = scmp.lt.s32.totalorder %s34_s30, %s34_s30 }
  0x1b   :  { %p260_p11 = scmp.ne.s32.totalorder %s34_s30, %s259_s12  ;;  %p265_p13 = scmp.lt.s32.totalorder %s259_s12, %s259_s12 }
  0x1d   :  { %p266_p0 = por %p265_p13, %p264_p12 }
  0x1f   :  { %p267_p1 = pnand %p266_p0, %p260_p11 }
  0x21   :  { %270 = shalt.err (!%p267_p1)
}
  0x22   :  { %s303_s0 = smov 64   ;;  %s304_s13 = smov 4  }
  0x23   :  { %39 = dma.hbm_to_vmem [thread:$0]  %s390_s3, 256, %s34_s30, [#allocation7], %s303_s0, %s303_s0, %s304_s13  }
  0x24   :  { %293 = dma.done.wait [#allocation4], 256  }
  0x25   :  { %294 = vsyncadd [#allocation4], 4294967040 }
  0x26   :  { %295 = dma.done.wait [#allocation7], 256  }
  0x27   :  { %296 = vsyncadd [#allocation7], 4294967040  ;;  %vm53_vm0 = vcmask 261120   ;;  %v51_v0 = vld [vmem:[#allocation3] sm:$0xff]  ;;  %v52_v1 = vld [vmem:[#allocation3 + $0x8] sm:$0xff]  ;;  %v305_v15 = vmov 0.0  }
  0x28   :  { %v54_v2 = vsel %vm53_vm0, %v51_v0, 0.0  ;;  %v57_v3 = vsel %vm53_vm0, %v52_v1, 0.0  ;;  %v221_v14 = vld [vmem:[#allocation6] sm:$0xff]   ;;  %204 = vmatprep.subr.bf16.mxu0 %v305_v15  ;;  %v222_v16 = vld [vmem:[#allocation6 + $0x8] sm:$0xff]   ;;  %vm306_vm1 = vmmov 0   ;;  %vm171_vm2 = vcmask 781312  }
  0x29   :  { %55 = vadd.xlane.f32.xlu0 %v54_v2  ;;  %205 = vmatpush3.bf16.msra.mxu0 %v221_v14  ;;  %v192_v25 = vld [vmem:[%s388_s1] ss:$0 sm:$0xff]  ;;  %s307_s19 = smov [#allocation8]  }
  0x2a   :  { %208 = vmatprep.mubr.msk.bf16.mxu0 %vm306_vm1, %v305_v15  ;;  %206 = vmatprep.subr.bf16.mxu0 %v305_v15  ;;  %v193_v29 = vld [vmem:[%s389_s2] ss:$0 sm:$0xff]  ;;  %s179_s1 = sshll.u32 %s307_s19, 4  ;;  %s180_s1 = int_to_ptr.vmem [resolvable:$true] %s179_s1 }
  0x2b   :  { %s271_s2 = scalar_lea.vmem %s180_s1, 128  ;;  %p276_p3 = scmp.lt.s32.totalorder %s180_s1, %s180_s1 }
  0x2c   :  { %p272_p2 = scmp.ne.s32.totalorder %s180_s1, %s271_s2  ;;  %p277_p4 = scmp.lt.s32.totalorder %s271_s2, %s271_s2 }
  0x2d   :  { %58 = vadd.xlane.f32.xlu0 %v57_v3  ;;  %207 = vmatpush3.bf16.msra.mxu0 %v222_v16 }
  0x2e   :  { %p278_p5 = por %p277_p4, %p276_p3 }
  0x30   :  { %p279_p6 = pnand %p278_p5, %p272_p2 }
  0xb6   :  { %v56_v4 = vpop.xlane.xlu0 %55 }
  0xb7   :  { %v61_v5 = vmul.f32 0.03125, %v56_v4 }
  0xb9   :  { %v63_v6 = vsub.f32 %v51_v0, %v61_v5 }
  0xba   :  { %v59_v7 = vpop.xlane.xlu0 %58 }
  0xbb   :  { %v62_v8 = vmul.f32 0.03125, %v59_v7  ;;  %v65_v9 = vmul.f32 %v63_v6, %v63_v6 }
  0xbd   :  { %v64_v10 = vsub.f32 %v52_v1, %v62_v8  ;;  %v67_v11 = vsel %vm53_vm0, %v65_v9, 0.0 }
  0xbe   :  { %68 = vadd.xlane.f32.xlu1 %v67_v11 }
  0xbf   :  { %v66_v12 = vmul.f32 %v64_v10, %v64_v10 }
  0xc1   :  { %v70_v13 = vsel %vm53_vm0, %v66_v12, 0.0 }
  0xc2   :  { %71 = vadd.xlane.f32.xlu1 %v70_v13 }
 0x14b   :  { %v69_v17 = vpop.xlane.xlu1 %68 }
 0x14c   :  { %v73_v18 = vmul.f32 0.03125, %v69_v17 }
 0x14e   :  { %v75_v19 = vadd.f32 1e-05, %v73_v18 }
 0x14f   :  { %v72_v20 = vpop.xlane.xlu1 %71 }
 0x150   :  { %223 = vrsqrt.f32 %v75_v19  ;;  %v74_v21 = vmul.f32 0.03125, %v72_v20 }
 0x152   :  { %v76_v22 = vadd.f32 1e-05, %v74_v21 }
 0x154   :  { %225 = vrsqrt.f32 %v76_v22 }
 0x15a   :  { %v224_v23 = vpop.eup %223 }
 0x15b   :  { %v79_v24 = vmul.f32 %v224_v23, %v63_v6 }
 0x15d   :  { %v88_v27 = vmul.f32 %v192_v25, %v79_v24 }
 0x15e   :  { %v226_v26 = vpop.eup %225 }
 0x15f   :  { %v80_v28 = vmul.f32 %v226_v26, %v64_v10  ;;  %v97_v31 = vadd.f32 %v193_v29, %v88_v27 }
 0x161   :  { %v89_v30 = vmul.f32 %v192_v25, %v80_v28 }
 0x163   :  { %v98_v32 = vadd.f32 %v193_v29, %v89_v30 }
 0x165   :  { %v99_v33 = vpack.c.bf16 %v98_v32, %v97_v31 }
 0x167   :  { %100 = vst.msk [vmem:[#allocation2] sm:$0xff] %vm53_vm0, %v99_v33 }
 0x16e   :  { %v101_v34 = vld [vmem:[#allocation2] sm:$0xff] }
 0x16f   :  { %209 = vmatmul.mubr.msk.bf16.vlgmr.msra.gmra.mrb[0].mxu0 %vm53_vm0, %v101_v34 }
 0x242   :  { %v156_v35 = vpop.f32.mrb[0].mxu0 }
 0x243   :  { %v199_v36 = vpack.c.bf16 %v156_v35, %v156_v35  ;;  %v210_v37 = vpop.f32.mrb[1].mxu0 }
 0x244   :  { %v159_v38 = vpop.f32.mrb[2].mxu0 }
 0x245   :  { %v200_v39 = vpack.c.bf16 %v159_v38, %v159_v38  ;;  %v211_v40 = vpop.f32.mrb[3].mxu0  ;;  %172 = vst.msk [vmem:[#allocation8] sm:$0xf] %vm171_vm2, %v199_v36 }
 0x247   :  { %173 = vst.msk [vmem:[#allocation8 + $0x4] sm:$0xf] %vm171_vm2, %v200_v39 }
 0x248   :  { %282 = shalt.err (!%p279_p6)
}
 0x249   :  { %s283_s22 = scalar_lea.hbm %s391_s4, 128 }
 0x24a   :  { %p284_p7 = scmp.ne.s32.totalorder %s391_s4, %s283_s22  ;;  %p287_p8 = scmp.lt.u32.totalorder %s283_s22, %s391_s4 }
 0x24c   :  { %p289_p9 = pnand %p287_p8, %p284_p7 }
 0x24e   :  { %292 = shalt.err (!%p289_p9)
}
 0x24f   :  { %185 = dma.vmem_to_hbm [thread:$0]  %s180_s1, 128, %s391_s4, [#allocation5], %s303_s0, %s303_s0, %s304_s13  }
 0x250   :  { %297 = dma.done.wait [#allocation5], 128  }
 0x251   :  { %298 = vsyncadd [#allocation5], 4294967168 }
 0x252   :  { %189 = vsyncpa [#allocation4], 1 }
 0x253   :  { %190 = vsyncpa [#allocation7], 1 }
 0x254   :  { %191 = vsyncpa [#allocation5], 1 }

</bundles_post_ra>
